<compile_context>
chip_gen: v7x
topology: tpu7x:2x2x1
jax: 0.10.0
libtpu: 0.0.40
codegen_flags: <defaults>
</compile_context>

<pallas_src>
import jax
import jax.numpy as jnp
from jax.experimental import pallas as pl
from jax.experimental.pallas import tpu as pltpu

_FL = 7                                  # fractional bits (wl=8, fl=7)
_QMAX = float(2 ** _FL - 1)              # 127
_INV_STEP = float(2 ** _FL)              # 128
_STEP = 1.0 / _INV_STEP                  # 2^-7
_LIMIT = _QMAX * _STEP                   # 127/128 (symmetric clamp bound)

_FUSED_MAX_ELEMS = 256 * 1024            # <= 1 MiB f32 -> single fused kernel
_TARGET_BLOCK_ELEMS = 512 * 1024         # ~2 MiB f32 blocks for streaming path
_WIDTHS = (1024, 512, 256, 128)          # preferred lane-dense last dims


def _choose_width(n):
    for w in _WIDTHS:
        if n % w == 0:
            return w
    return None


def _scale_factors(max_entry):
    """Returns (1,2) f32 [k1, k2]: y = clip(round(x*k1), -127, 127)*k2.

    Guards the all-zero case (max==0 -> scale forced to 1.0, output stays 0).
    """
    m = max_entry.reshape(()).astype(jnp.float32)
    scale = jnp.where(m > 0, jnp.exp2(jnp.ceil(jnp.log2(m))), jnp.float32(1.0))
    k1 = jnp.float32(_INV_STEP) / scale          # exact: scale is a power of 2
    k2 = scale * jnp.float32(_STEP)
    return jnp.stack([k1, k2]).reshape(1, 2)


def _fused_kernel(x_ref, o_ref):
    """Single-pass path: max|x| + quantize on a whole-array VMEM block."""
    x = x_ref[...].astype(jnp.float32)
    m = jnp.max(jnp.abs(x))
    scale = jnp.where(m > 0, jnp.exp2(jnp.ceil(jnp.log2(m))), jnp.float32(1.0))
    k1 = jnp.float32(_INV_STEP) / scale
    k2 = scale * jnp.float32(_STEP)
    # TODO(synk): qtorch 'nearest' rounds .5 ties away from zero; jnp.round is
    # half-to-even (differs only on exact ties, negligible for real data).
    q = jnp.clip(jnp.round(x * k1), -_QMAX, _QMAX) * k2
    o_ref[...] = q.astype(o_ref.dtype)


def _quantize_streaming(x2d, out_dtype, block_rows):
    """Two-pass path for large tensors: max|x| reduction, then quantization."""
    rows, width = x2d.shape
    num_blocks = pl.cdiv(rows, block_rows)
    tail = rows % block_rows  # static Python int

    # ---- Pass 1: global max(|x|) into an SMEM scalar (sequential grid). ----
    def maxabs_kernel(x_ref, out_ref):
        i = pl.program_id(0)

        @pl.when(i == 0)
        def _():
            out_ref[0, 0] = jnp.float32(0.0)

        a = jnp.abs(x_ref[...].astype(jnp.float32))
        if tail:
            # Last block is partial: OOB rows hold unspecified data -> mask.
            row = (jax.lax.broadcasted_iota(jnp.int32, a.shape, 0)
                   + i * block_rows)
            a = jnp.where(row < rows, a, jnp.float32(0.0))
        out_ref[0, 0] = jnp.maximum(out_ref[0, 0], jnp.max(a))

    max_entry = pl.pallas_call(
        maxabs_kernel,
        out_shape=jax.ShapeDtypeStruct((1, 1), jnp.float32),
        grid_spec=pltpu.PrefetchScalarGridSpec(
            num_scalar_prefetch=0,
            grid=(num_blocks,),
            in_specs=[pl.BlockSpec((block_rows, width), lambda i: (i, 0))],
            out_specs=pl.BlockSpec(memory_space=pltpu.SMEM),
        ),
        compiler_params=pltpu.CompilerParams(
            dimension_semantics=("arbitrary",)),   # running-max reduction
    )(x2d)
    # TODO(synk): on v7x, emitting per-block partial maxes with "parallel"
    # semantics would let both TensorCores stream pass 1.

    # Fold the scale math into two constants once (tiny XLA ops on a scalar).
    k = _scale_factors(max_entry)

    # ---- Pass 2: elementwise quantize, two multiplies + round + clip. ----
    def quant_kernel(k_ref, x_ref, o_ref):
        x = x_ref[...].astype(jnp.float32)
        q = jnp.clip(jnp.round(x * k_ref[0, 0]), -_QMAX, _QMAX) * k_ref[0, 1]
        o_ref[...] = q.astype(o_ref.dtype)

    out2d = pl.pallas_call(
        quant_kernel,
        out_shape=jax.ShapeDtypeStruct((rows, width), out_dtype),
        grid_spec=pltpu.PrefetchScalarGridSpec(
            num_scalar_prefetch=0,
            grid=(num_blocks,),
            in_specs=[pl.BlockSpec(memory_space=pltpu.SMEM),
                      pl.BlockSpec((block_rows, width), lambda i: (i, 0))],
            out_specs=pl.BlockSpec((block_rows, width), lambda i: (i, 0)),
        ),
        compiler_params=pltpu.CompilerParams(
            dimension_semantics=("parallel",)),
    )(k, x2d)
    return out2d


def quantize(x):
    """Pallas implementation of Quantizer.forward (QG with defaults)."""
    orig_shape = x.shape
    orig_dtype = x.dtype
    n = int(x.size)

    flat = x.reshape(-1)                      # free bitcast (contiguous)
    width = _choose_width(n)
    if width is None:
        # Ragged total size: pad once to a lane multiple (zeros don't change
        # max|x| and the padded tail is sliced off below).
        # TODO(synk): handle ragged sizes fully in-kernel to avoid this copy.
        pad = (-n) % 128
        flat = jnp.pad(flat, (0, pad))
        width = 128
    rows = flat.size // width
    x2d = flat.reshape(rows, width)

    if n <= _FUSED_MAX_ELEMS:
        # Single fused kernel: whole array as one VMEM block, 1 read + 1 write.
        out2d = pl.pallas_call(
            _fused_kernel,
            out_shape=jax.ShapeDtypeStruct((rows, width), orig_dtype),
            in_specs=[pl.BlockSpec((rows, width), lambda: (0, 0))],
            out_specs=pl.BlockSpec((rows, width), lambda: (0, 0)),
        )(x2d)
    else:
        block_rows = max(8, _TARGET_BLOCK_ELEMS // width)   # ~2 MiB blocks
        block_rows = min(block_rows, rows)
        block_rows = max(8, (block_rows // 8) * 8)           # sublane aligned
        out2d = _quantize_streaming(x2d, orig_dtype, block_rows)

    out_flat = out2d.reshape(-1)
    if out_flat.size != n:
        out_flat = out_flat[:n]
    return out_flat.reshape(orig_shape)


if __name__ == "__main__":
    key = jax.random.PRNGKey(0)

    def reference(x):
        m = jnp.max(jnp.abs(x))
        scale = jnp.where(m > 0, jnp.exp2(jnp.ceil(jnp.log2(m))), 1.0)
        q = jnp.round((x / scale) * _INV_STEP) * _STEP
        return (jnp.clip(q, -_LIMIT, _LIMIT) * scale).astype(x.dtype)

    # 1) Small NCHW activation -> fused single-pass path.
    x_small = jax.random.normal(key, (2, 4, 16, 16), dtype=jnp.float32)
    y_small = quantize(x_small)
    jax.block_until_ready(y_small)
    assert y_small.shape == x_small.shape and y_small.dtype == x_small.dtype
    assert jnp.allclose(y_small, reference(x_small), atol=1e-6)

    # 2) Larger tensor -> two-pass streaming path with a partial last block
    #    (exercises the in-kernel tail mask of the max pass).
    x_big = jax.random.normal(jax.random.PRNGKey(1), (2051, 128),
                              dtype=jnp.float32)
    y_big = quantize(x_big)
    jax.block_until_ready(y_big)
    assert jnp.allclose(y_big, reference(x_big), atol=1e-6)

    # 3) All-zero input must not produce NaN (scale guard).
    y_zero = quantize(jnp.zeros((4, 8, 8), jnp.float32))
    jax.block_until_ready(y_zero)
    assert bool(jnp.all(y_zero == 0))

    print("KERNEL_OK")
</pallas_src>

<mosaic_0001>
module attributes {stable_mosaic.version = 11 : i64} {
  func.func @_fused_kernel(%arg0: memref<2x1024xf32, #tpu.memory_space<vmem>>, %arg1: memref<2x1024xf32, #tpu.memory_space<vmem>>) attributes {dimension_semantics = [], scalar_prefetch = 0 : i64, scratch_operands = 0 : i64, tpu.core_type = #tpu.core_type<tc>} {
    %c0 = arith.constant 0 : index
    %c0_0 = arith.constant 0 : index
    %0 = vector.load %arg0[%c0, %c0_0] : memref<2x1024xf32, #tpu.memory_space<vmem>>, vector<2x1024xf32>
    %1 = math.absf %0 : vector<2x1024xf32>
    %2 = vector.shape_cast %1 : vector<2x1024xf32> to vector<1x2x1024xf32>
    %cst = arith.constant dense<0xFF800000> : vector<1xf32>
    %3 = vector.multi_reduction <maximumf>, %2, %cst [1, 2] : vector<1x2x1024xf32> to vector<1xf32>
    %4 = vector.shape_cast %3 : vector<1xf32> to vector<1x1x1xf32>
    %5 = vector.extract %4[0, 0, 0] : f32 from vector<1x1x1xf32>
    %cst_1 = arith.constant 0.000000e+00 : f32
    %6 = arith.cmpf ogt, %5, %cst_1 : f32
    %7 = math.log %5 : f32
    %cst_2 = arith.constant 2.000000e+00 : f32
    %8 = math.log %cst_2 : f32
    %9 = arith.divf %7, %8 : f32
    %10 = math.ceil %9 : f32
    %11 = math.exp2 %10 : f32
    %cst_3 = arith.constant 1.000000e+00 : f32
    %12 = arith.select %6, %11, %cst_3 : f32
    %cst_4 = arith.constant 1.280000e+02 : f32
    %13 = arith.divf %cst_4, %12 : f32
    %cst_5 = arith.constant 7.812500e-03 : f32
    %14 = arith.mulf %12, %cst_5 : f32
    %15 = vector.broadcast %13 : f32 to vector<2x1024xf32>
    %16 = arith.mulf %0, %15 : vector<2x1024xf32>
    %17 = math.roundeven %16 : vector<2x1024xf32>
    %cst_6 = arith.constant -1.270000e+02 : f32
    %cst_7 = arith.constant 1.270000e+02 : f32
    %18 = vector.broadcast %cst_6 : f32 to vector<2x1024xf32>
    %19 = arith.maximumf %18, %17 : vector<2x1024xf32>
    %20 = vector.broadcast %cst_7 : f32 to vector<2x1024xf32>
    %21 = arith.minimumf %20, %19 : vector<2x1024xf32>
    %22 = vector.broadcast %14 : f32 to vector<2x1024xf32>
    %23 = arith.mulf %21, %22 : vector<2x1024xf32>
    %c0_8 = arith.constant 0 : index
    %c0_9 = arith.constant 0 : index
    %24 = vector.load %arg1[%c0_8, %c0_9] : memref<2x1024xf32, #tpu.memory_space<vmem>>, vector<2x1024xf32>
    tpu.vector_store %arg1[%c0_8, %c0_9], %23 {strides = array<i32>} : memref<2x1024xf32, #tpu.memory_space<vmem>>, vector<2x1024xf32>,
    return
  }
}

</mosaic_0001>

<bundles_post_ra>
// kernel: tpu_custom_call.1
= control target key start
LH: loop header
LB: loop body
LE: loop exit
PB: predicated region body
PF: predicated region fallthrough
CT: control target
= control target key end

     0   :  { %6 = vsyncpa [#allocation3], 0  ;;  %s255_s0 = inlined_call_operand.hbm [shape: f32[2,1024], index: 0, kind: input, shape index: {}]   ;;  %s256_s1 = inlined_call_operand.hbm [shape: f32[2,1024], index: 1, kind: output, shape index: {}]  }
   0x1   :  { %7 = vsyncpa [#allocation4], 0  ;;  %s210_s6 = smov [#allocation2]   ;;  %s162_s10 = scalar_lea.hbm %s255_s0, 256 }
   0x2   :  { %s14_s7 = sshll.u32 %s210_s6, 4  ;;  %p163_p0 = scmp.ne.s32.totalorder %s255_s0, %s162_s10  ;;  %s15_s7 = int_to_ptr.vmem [resolvable:$true] %s14_s7 }
   0x3   :  { %p166_p1 = scmp.lt.u32.totalorder %s162_s10, %s255_s0 }
   0x5   :  { %p168_p2 = pnand %p166_p1, %p163_p0 }
   0x7   :  { %171 = shalt.err (!%p168_p2)
}
   0x8   :  { %s172_s15 = scalar_lea.vmem %s15_s7, 256  ;;  %p177_p4 = scmp.lt.s32.totalorder %s15_s7, %s15_s7 }
   0x9   :  { %p173_p3 = scmp.ne.s32.totalorder %s15_s7, %s172_s15  ;;  %p178_p5 = scmp.lt.s32.totalorder %s172_s15, %s172_s15 }
   0xb   :  { %p179_p6 = por %p178_p5, %p177_p4 }
   0xd   :  { %p180_p7 = pnand %p179_p6, %p173_p3 }
   0xf   :  { %183 = shalt.err (!%p180_p7)
}
  0x10   :  { %17 = dma.hbm_to_vmem [thread:$0]  %s255_s0, 256, %s15_s7, [#allocation3]  }
  0x11   :  { %206 = dma.done.wait [#allocation3], 256  }
  0x12   :  { %207 = vsyncadd [#allocation3], 4294967040  ;;  %v31_v0 = vlaneseq  ;;  %v211_v1 = vmov 1983009808   ;;  %v21_v6 = vld [vmem:[#allocation2] sm:$0xff]  ;;  %v22_v7 = vld [vmem:[#allocation2 + $0x8] sm:$0xff] }
  0x13   :  { %v29_v2 = vunpack.c.l.s4 %v211_v1  ;;  %v23_v8 = vand.u32 2147483647, %v21_v6  ;;  %v24_v9 = vand.u32 2147483647, %v22_v7  ;;  %vm69_vm0 = vcmask 1041408   ;;  %s212_s25 = smov [#allocation5]  }
  0x14   :  { %v32_v3 = vshrl.u32 %v31_v0, 7  ;;  %s132_s26 = sshll.u32 %s212_s25, 4  ;;  %s133_s26 = int_to_ptr.vmem [resolvable:$true] %s132_s26 }
  0x15   :  { %v30_v4 = vunpack.c.0.s8 %v29_v2  ;;  %v27_v10 = vcombine.high %v23_v8, %v23_v8  ;;  %v44_v12 = vcombine.high %v24_v9, %v24_v9  ;;  %s184_s27 = scalar_lea.vmem %s133_s26, 256  ;;  %p189_p10 = scmp.lt.s32.totalorder %s133_s26, %s133_s26 }
  0x16   :  { %p185_p9 = scmp.ne.s32.totalorder %s133_s26, %s184_s27  ;;  %p190_p11 = scmp.lt.s32.totalorder %s184_s27, %s184_s27 }
  0x17   :  { %v33_v5 = vsub.s32 %v30_v4, %v32_v3 }
  0x18   :  { %p191_p12 = por %p190_p11, %p189_p10 }
  0x19   :  { %v34_v11 = vrot.slane %v23_v8, %v33_v5  ;;  %v51_v13 = vrot.slane %v24_v9, %v33_v5  ;;  %v41_v14 = vrot.slane %v27_v10, %v33_v5  ;;  %v58_v16 = vrot.slane %v44_v12, %v33_v5 }
  0x1a   :  { %p192_p13 = pnand %p191_p12, %p185_p9 }
  0x1b   :  { %v42_v15 = vcombine.high %v34_v11, %v34_v11  ;;  %v59_v17 = vcombine.high %v51_v13, %v51_v13  ;;  %v70_v18 = vsel %vm69_vm0, %v34_v11, -inf  ;;  %v74_v19 = vsel %vm69_vm0, %v51_v13, -inf }
  0x1c   :  { %v43_v20 = vcombine.high %v41_v14, %v41_v14  ;;  %v60_v21 = vcombine.high %v58_v16, %v58_v16  ;;  %v72_v23 = vsel %vm69_vm0, %v41_v14, -inf  ;;  %v75_v24 = vmax.f32 %v70_v18, %v74_v19 }
  0x1d   :  { %v71_v22 = vsel %vm69_vm0, %v42_v15, -inf  ;;  %v76_v25 = vsel %vm69_vm0, %v59_v17, -inf  ;;  %v78_v26 = vsel %vm69_vm0, %v58_v16, -inf }
  0x1e   :  { %v73_v27 = vsel %vm69_vm0, %v43_v20, -inf  ;;  %v77_v28 = vmax.f32 %v71_v22, %v76_v25  ;;  %v79_v29 = vmax.f32 %v72_v23, %v78_v26  ;;  %v80_v30 = vsel %vm69_vm0, %v60_v21, -inf }
  0x1f   :  { %v81_v31 = vmax.f32 %v73_v27, %v80_v30 }
  0x20   :  { %v82_v32 = vmax.f32 %v75_v24, %v77_v28 }
  0x21   :  { %v83_v33 = vmax.f32 %v79_v29, %v81_v31 }
  0x23   :  { %v84_v34 = vmax.f32 %v82_v32, %v83_v33 }
  0x25   :  { %85 = vmax.xlane.f32.xlu0 %v84_v34 }
  0xb2   :  { %v86_v35 = vpop.xlane.xlu0 %85 }
  0xb3   :  { %v87_v36 = vrot.slane %v86_v35, 4 }
  0xb5   :  { %v88_v37 = vmax.f32 %v86_v35, %v87_v36 }
  0xb7   :  { %v89_v38 = vrot.slane %v88_v37, 2 }
  0xb9   :  { %v90_v39 = vmax.f32 %v88_v37, %v89_v38 }
  0xbb   :  { %v91_v40 = vrot.slane %v90_v39, 1 }
  0xbd   :  { %v92_v41 = vmax.f32 %v90_v39, %v91_v40 }
  0xbf   :  { %143 = vpush %v92_v41 }
  0xf0   :  { %s144_s0 = spop %143 }
  0xf1   :  { %v95_v42 = vstv %s144_s0  ;;  %p94_p8 = scmp.gt.f32.partialorder %s144_s0, 0.0 }
  0xf2   :  { %156 = vlog2.f32 %v95_v42 }
  0xfc   :  { %v157_v43 = vpop.eup %156 }
  0xfd   :  { %v97_v44 = vmul.f32 0.6931472, %v157_v43 }
  0xff   :  { %145 = vpush %v97_v44 }
 0x130   :  { %s146_s18 = spop %145 }
 0x131   :  { %s101_s19 = smul.f32 1.442695, %s146_s18 }
 0x133   :  { %s102_s20 = sceil.f32 %s101_s19 }
 0x134   :  { %v103_v45 = vstv %s102_s20 }
 0x135   :  { %158 = vpow2.f32 %v103_v45 }
 0x13f   :  { %v159_v46 = vpop.eup %158 }
 0x140   :  { %147 = vpush %v159_v46 }
 0x171   :  { %s148_s21 = spop %147 }
 0x172   :  { %s258_s21 = smov (!%p94_p8, %s148_s21), 1.0 }
 0x173   :  { %v107_v47 = vstv %s258_s21  ;;  %s111_s24 = smul.f32 0.0078125, %s258_s21 }
 0x174   :  { %160 = vrcp.f32 %v107_v47 }
 0x175   :  { %v121_v56 = vstv %s111_s24 }
 0x17e   :  { %v161_v48 = vpop.eup %160 }
 0x17f   :  { %149 = vpush %v161_v48 }
 0x1b0   :  { %s150_s22 = spop %149 }
 0x1b1   :  { %s110_s23 = smul.f32 128.0, %s150_s22 }
 0x1b3   :  { %v112_v49 = vstv %s110_s23 }
 0x1b4   :  { %v113_v50 = vmul.f32 %v112_v49, %v21_v6  ;;  %v114_v51 = vmul.f32 %v112_v49, %v22_v7 }
 0x1b6   :  { %v151_v52 = vround.rtne.f32 %v113_v50  ;;  %v152_v53 = vround.rtne.f32 %v114_v51 }
 0x1b8   :  { %v141_v54 = vclamps-f32 %v151_v52, 127.0  ;;  %v142_v55 = vclamps-f32 %v152_v53, 127.0 }
 0x1ba   :  { %v122_v57 = vmul.f32 %v141_v54, %v121_v56  ;;  %v123_v58 = vmul.f32 %v142_v55, %v121_v56 }
 0x1bc   :  { %124 = vst [vmem:[#allocation5] sm:$0xff] %v122_v57  ;;  %125 = vst [vmem:[#allocation5 + $0x8] sm:$0xff] %v123_v58 }
 0x1bd   :  { %195 = shalt.err (!%p192_p13)
}
 0x1be   :  { %s196_s30 = scalar_lea.hbm %s256_s1, 256 }
 0x1bf   :  { %p197_p0 = scmp.ne.s32.totalorder %s256_s1, %s196_s30  ;;  %p200_p1 = scmp.lt.u32.totalorder %s196_s30, %s256_s1 }
 0x1c1   :  { %p202_p2 = pnand %p200_p1, %p197_p0 }
 0x1c3   :  { %205 = shalt.err (!%p202_p2)
}
 0x1c4   :  { %135 = dma.vmem_to_hbm [thread:$0]  %s133_s26, 256, %s256_s1, [#allocation4]  }
 0x1c5   :  { %208 = dma.done.wait [#allocation4], 256  }
 0x1c6   :  { %209 = vsyncadd [#allocation4], 4294967040 }
 0x1c7   :  { %139 = vsyncpa [#allocation3], 1 }
 0x1c8   :  { %140 = vsyncpa [#allocation4], 1 }

</bundles_post_ra>
